<compile_context>
chip_gen: v5e
topology: v5e:2x2
jax: 0.10.0
libtpu: 0.0.40
codegen_flags: <defaults>
</compile_context>

<pallas_src>
import jax
import jax.numpy as jnp
from jax.experimental import pallas as pl
from jax.experimental.pallas import tpu as pltpu


_MiB = 1024 * 1024


def _round_up(x, m):
    return ((x + m - 1) // m) * m


def _round_down(x, m):
    return (x // m) * m


def _sublane_align(itemsize):
    # Min sublane tile: 8 rows for 4-byte, 16 for 2-byte, 32 for 1-byte dtypes.
    return max(8, 32 // max(1, itemsize))


def _vmem_limit_bytes(tile_bytes):
    # 2 input buffers + 2 output buffers (double buffering) plus slack.
    want = 4 * tile_bytes + 2 * _MiB
    return int(min(64 * _MiB, max(32 * _MiB, want)))


# ----------------------------------------------------------------------------
# Kernel
# ----------------------------------------------------------------------------
def _make_l96_kernel(f_const, ring_axis):
    # Plain Python float -> folded as a scalar literal inside the kernel
    # (no captured constant, no SMEM operand, no extra DMA).
    f_const = float(f_const)

    def kernel(x_ref, o_ref):
        x = x_ref[...]
        # Circular shifts along the ring axis.  The ring is always whole
        # inside a block, so the wrap never crosses a tile boundary.
        x_p1 = jnp.roll(x, 1, axis=ring_axis)
        x_m1 = jnp.roll(x, -1, axis=ring_axis)
        x_m2 = jnp.roll(x, -2, axis=ring_axis)
        out = (x_p1 - x_m2) * x_m1 - x + f_const
        o_ref[...] = out.astype(o_ref.dtype)

    return kernel


# ----------------------------------------------------------------------------
# Tile planning
# ----------------------------------------------------------------------------
def _plan_lane_ring(batch, n_state, itemsize, max_tile_bytes):
    """Natural layout [batch, n_state] (ring on lanes, n_state % 128 == 0)."""
    align = _sublane_align(itemsize)
    row_bytes = n_state * itemsize
    tb = _round_down(max(align, max_tile_bytes // row_bytes), align)
    if batch >= 2 * align:
        # Keep >=2 grid steps so v7x's two TensorCores both get work.
        tb = min(tb, _round_up(pl.cdiv(batch, 2), align))
    if tb >= batch:
        tb = batch  # single block; full-extent sublane dim is always legal
    return tb


def _plan_sublane_ring(batch, n_state, itemsize, max_tile_bytes):
    """Transposed layout [n_state, batch] (ring on sublanes, batch on lanes)."""
    # Padded footprint: ring padded to the sublane multiple, batch tile is a
    # multiple of 128 lanes (no lane padding).
    col_bytes = _round_up(n_state, _sublane_align(itemsize)) * itemsize
    tb = _round_down(max(128, max_tile_bytes // col_bytes), 128)
    if batch > 128:
        # Keep >=2 grid steps so v7x's two TensorCores both get work.
        tb = min(tb, _round_up(pl.cdiv(batch, 2), 128))
    if tb >= batch:
        tb = batch  # single block; full-extent lane dim is always legal
    return tb


# ----------------------------------------------------------------------------
# Wrapper
# ----------------------------------------------------------------------------
def l96_forward(t, x, F=8.0, *, max_tile_bytes=4 * _MiB):
    """Pallas implementation of L96.forward(t, x, F).  Ring axis is last."""
    del t  # unused; mirrors the torch module's signature
    # TODO(synk): the torch module's `self.fe` forward-eval counter is
    # host-side Python state (no tensor compute); intentionally not modeled.
    orig_shape = x.shape
    n_state = orig_shape[-1]
    x2d = x.reshape(-1, n_state)
    batch = x2d.shape[0]
    itemsize = x2d.dtype.itemsize

    if n_state % 128 == 0:
        # Ring already fills whole lanes: keep the natural layout.
        tb = _plan_lane_ring(batch, n_state, itemsize, max_tile_bytes)
        block = (tb, n_state)
        tile_bytes = tb * n_state * itemsize
        out2d = pl.pallas_call(
            _make_l96_kernel(F, ring_axis=1),
            out_shape=jax.ShapeDtypeStruct((batch, n_state), x2d.dtype),
            grid=(pl.cdiv(batch, tb),),
            in_specs=[pl.BlockSpec(block, lambda i: (i, 0))],
            out_specs=pl.BlockSpec(block, lambda i: (i, 0)),
            compiler_params=pltpu.CompilerParams(
                dimension_semantics=("parallel",),
                vmem_limit_bytes=_vmem_limit_bytes(tile_bytes)),
        )(x2d)
        return out2d.reshape(orig_shape)

    # Sublane-ring layout for non-128-multiple rings (classic N=40): present
    # blocks as [n_state, batch_tile] with batch on lanes -> unmasked,
    # lane-dense loads/stores; the circular shifts become sublane rolls.
    # The wrapper-side transpose is layout plumbing, not compute.
    xt = x2d.T  # [n_state, batch]
    tb = _plan_sublane_ring(batch, n_state, itemsize, max_tile_bytes)
    block = (n_state, tb)
    tile_bytes = _round_up(n_state, _sublane_align(itemsize)) * tb * itemsize
    out_t = pl.pallas_call(
        _make_l96_kernel(F, ring_axis=0),
        out_shape=jax.ShapeDtypeStruct((n_state, batch), x2d.dtype),
        grid=(pl.cdiv(batch, tb),),
        in_specs=[pl.BlockSpec(block, lambda i: (0, i))],
        out_specs=pl.BlockSpec(block, lambda i: (0, i)),
        compiler_params=pltpu.CompilerParams(
            dimension_semantics=("parallel",),
            vmem_limit_bytes=_vmem_limit_bytes(tile_bytes)),
    )(xt)
    return out_t.T.reshape(orig_shape)


def l96_reference(t, x, F=8.0):
    # Pure-JAX reference mirroring the torch module exactly.
    del t
    x_m2 = jnp.roll(x, -2, axis=-1)
    x_m1 = jnp.roll(x, -1, axis=-1)
    x_p1 = jnp.roll(x, 1, axis=-1)
    return (x_p1 - x_m2) * x_m1 - x + F * jnp.ones_like(x)


if __name__ == "__main__":
    key = jax.random.PRNGKey(0)
    t = jnp.float32(0.0)
    k1, k2, k3 = jax.random.split(key, 3)

    # Test A: classic L96 ring N=40, 3-D batch -> sublane-ring layout path.
    xa = jax.random.normal(k1, (4, 16, 40), dtype=jnp.float32)
    outa = jax.block_until_ready(l96_forward(t, xa, F=8.0))
    refa = l96_reference(t, xa, F=8.0)
    assert outa.shape == xa.shape and outa.dtype == xa.dtype
    assert jnp.allclose(outa, refa, atol=1e-5, rtol=1e-5), "mismatch (N=40)"

    # Test B: lane-aligned ring, multi-step grid with a partial tail block
    # (tiny tile on purpose to exercise the pipelined grid at small shapes).
    xb = jax.random.normal(k2, (200, 128), dtype=jnp.float32)
    outb = jax.block_until_ready(
        l96_forward(t, xb, F=3.5, max_tile_bytes=16 * 1024))
    refb = l96_reference(t, xb, F=3.5)
    assert outb.shape == xb.shape and outb.dtype == xb.dtype
    assert jnp.allclose(outb, refb, atol=1e-5, rtol=1e-5), "mismatch (lane ring)"

    # Test C: sublane-ring layout with multiple 128-lane tiles + partial tail.
    xc = jax.random.normal(k3, (300, 40), dtype=jnp.float32)
    outc = jax.block_until_ready(
        l96_forward(t, xc, F=8.0, max_tile_bytes=64 * 1024))
    refc = l96_reference(t, xc, F=8.0)
    assert outc.shape == xc.shape and outc.dtype == xc.dtype
    assert jnp.allclose(outc, refc, atol=1e-5, rtol=1e-5), "mismatch (tiled sublane)"

    print("KERNEL_OK")
</pallas_src>

<mosaic_0001>
module attributes {stable_mosaic.version = 11 : i64} {
  func.func @kernel(%arg0: i32, %arg1: memref<40x64xf32, #tpu.memory_space<vmem>>, %arg2: memref<40x64xf32, #tpu.memory_space<vmem>>) attributes {dimension_semantics = [#tpu.dimension_semantics<parallel>], iteration_bounds = array<i64: 1>, scalar_prefetch = 0 : i64, scratch_operands = 0 : i64, tpu.core_type = #tpu.core_type<tc>, window_params = [{transform_indices = @transform_0, window_bounds = array<i64: 40, 64>}, {transform_indices = @transform_1, window_bounds = array<i64: 40, 64>}]} {
    %c0 = arith.constant 0 : index
    %c0_0 = arith.constant 0 : index
    %0 = vector.load %arg1[%c0, %c0_0] : memref<40x64xf32, #tpu.memory_space<vmem>>, vector<40x64xf32>
    %1 = vector.extract_strided_slice %0 {offsets = [39, 0], sizes = [1, 64], strides = [1, 1]} : vector<40x64xf32> to vector<1x64xf32>
    %2 = vector.extract_strided_slice %0 {offsets = [0, 0], sizes = [39, 64], strides = [1, 1]} : vector<40x64xf32> to vector<39x64xf32>
    %3 = tpu.concatenate %1, %2 in 0 : vector<1x64xf32>, vector<39x64xf32> -> vector<40x64xf32>
    %4 = vector.extract_strided_slice %0 {offsets = [1, 0], sizes = [39, 64], strides = [1, 1]} : vector<40x64xf32> to vector<39x64xf32>
    %5 = vector.extract_strided_slice %0 {offsets = [0, 0], sizes = [1, 64], strides = [1, 1]} : vector<40x64xf32> to vector<1x64xf32>
    %6 = tpu.concatenate %4, %5 in 0 : vector<39x64xf32>, vector<1x64xf32> -> vector<40x64xf32>
    %7 = vector.extract_strided_slice %0 {offsets = [2, 0], sizes = [38, 64], strides = [1, 1]} : vector<40x64xf32> to vector<38x64xf32>
    %8 = vector.extract_strided_slice %0 {offsets = [0, 0], sizes = [2, 64], strides = [1, 1]} : vector<40x64xf32> to vector<2x64xf32>
    %9 = tpu.concatenate %7, %8 in 0 : vector<38x64xf32>, vector<2x64xf32> -> vector<40x64xf32>
    %10 = arith.subf %3, %9 : vector<40x64xf32>
    %11 = arith.mulf %10, %6 : vector<40x64xf32>
    %12 = arith.subf %11, %0 : vector<40x64xf32>
    %cst = arith.constant 8.000000e+00 : f32
    %13 = vector.broadcast %cst : f32 to vector<40x64xf32>
    %14 = arith.addf %12, %13 : vector<40x64xf32>
    %c0_1 = arith.constant 0 : index
    %c0_2 = arith.constant 0 : index
    %15 = vector.load %arg2[%c0_1, %c0_2] : memref<40x64xf32, #tpu.memory_space<vmem>>, vector<40x64xf32>
    tpu.vector_store %arg2[%c0_1, %c0_2], %14 {strides = array<i32>} : memref<40x64xf32, #tpu.memory_space<vmem>>, vector<40x64xf32>,
    return
  }
  func.func @transform_0(%arg0: i32) -> (i32, i32) {
    %c0_i32 = arith.constant 0 : i32
    %c0_i32_0 = arith.constant 0 : i32
    return %c0_i32, %arg0 : i32, i32
  }
  func.func @transform_1(%arg0: i32) -> (i32, i32) {
    %c0_i32 = arith.constant 0 : i32
    %c0_i32_0 = arith.constant 0 : i32
    return %c0_i32, %arg0 : i32, i32
  }
}

</mosaic_0001>

<bundles_post_ra>
// kernel: tpu_custom_call.1
= control target key start
LH: loop header
LB: loop body
LE: loop exit
PB: predicated region body
PF: predicated region fallthrough
CT: control target
= control target key end

     0   :  { %6 = vsyncpa [#allocation3], 0  ;;  %s233_s0 = inlined_call_operand.hbm [shape: f32[40,64], index: 0, kind: input, shape index: {}]   ;;  %s234_s1 = inlined_call_operand.hbm [shape: f32[40,64], index: 1, kind: output, shape index: {}]  }
   0x1   :  { %7 = vsyncpa [#allocation4], 0  ;;  %s12_s8 = sshll.u32 %s233_s0, 4  ;;  %s187_s9 = smov [#allocation2]   ;;  %s13_s8 = int_to_ptr.hbm [resolvable:$true] %s12_s8 }
   0x2   :  { %s14_s10 = sshll.u32 %s187_s9, 4  ;;  %s188_s11 = smov 128   ;;  %s15_s10 = int_to_ptr.vmem [resolvable:$true] %s14_s10 }
   0x3   :  { %s189_s12 = smov 8  }
   0x4   :  { %20 = dma.hbm_to_vmem [thread:$0]  %s13_s8, 640, %s15_s10, [#allocation3], %s188_s11, %s188_s11, %s189_s12  }
   0x5   :  { %183 = dma.done.wait [#allocation3], 640  }
   0x6   :  { %184 = vsyncadd [#allocation3], 4294966656  ;;  %v25_v0 = vld [vmem:[#allocation2] sm:$0xff]  ;;  %v26_v1 = vld [vmem:[#allocation2 + $0x8] sm:$0xff]  ;;  %vm37_vm0 = vcmask 1040384   ;;  %vm52_vm1 = vcmask 1046528  }
   0x7   :  { %v29_v2 = vld [vmem:[#allocation2 + $0x20] sm:$0xff]  ;;  %vm69_vm2 = vcmask 1045504   ;;  %v38_v4 = vrot.slane %v25_v0, 7  ;;  %v53_v5 = vrot.slane %v25_v0, 1  ;;  %v54_v6 = vrot.slane %v26_v1, 1  ;;  %v27_v7 = vld [vmem:[#allocation2 + $0x10] sm:$0xff] }
   0x8   :  { %v31_v3 = vrot.slane %v29_v2, 7  ;;  %v70_v8 = vrot.slane %v25_v0, 2  ;;  %v71_v9 = vrot.slane %v26_v1, 2  ;;  %v39_v10 = vrot.slane %v26_v1, 7  ;;  %v28_v12 = vld [vmem:[#allocation2 + $0x18] sm:$0xff]  ;;  %s190_s0 = smov [#allocation5]  }
   0x9   :  { %v56_v11 = vrot.slane %v27_v7, 1  ;;  %v55_v14 = vsel %vm52_vm1, %v53_v5, %v54_v6  ;;  %v73_v15 = vrot.slane %v27_v7, 2  ;;  %v41_v16 = vrot.slane %v27_v7, 7  ;;  %s116_s13 = sshll.u32 %s190_s0, 4  ;;  %s118_s16 = sshll.u32 %s234_s1, 4  ;;  %s117_s13 = int_to_ptr.vmem [resolvable:$true] %s116_s13  ;;  %s119_s16 = int_to_ptr.hbm [resolvable:$true] %s118_s16 }
   0xa   :  { %v51_v13 = vsel %vm37_vm0, %v31_v3, %v38_v4  ;;  %v72_v17 = vsel %vm69_vm2, %v70_v8, %v71_v9  ;;  %v40_v18 = vsel %vm37_vm0, %v38_v4, %v39_v10  ;;  %v58_v20 = vrot.slane %v28_v12, 1 }
   0xb   :  { %v57_v19 = vsel %vm52_vm1, %v54_v6, %v56_v11  ;;  %v86_v21 = vsub.f32 %v51_v13, %v72_v17  ;;  %v74_v22 = vsel %vm69_vm2, %v71_v9, %v73_v15  ;;  %v42_v23 = vsel %vm37_vm0, %v39_v10, %v41_v16 }
   0xc   :  { %v75_v24 = vrot.slane %v28_v12, 2  ;;  %vm106_vm3 = vcmask 523264   ;;  %v87_v25 = vsub.f32 %v40_v18, %v74_v22  ;;  %v43_v26 = vrot.slane %v28_v12, 7 }
   0xd   :  { %v60_v27 = vrot.slane %v29_v2, 1  ;;  %v91_v28 = vmul.f32 %v86_v21, %v55_v14  ;;  %v59_v29 = vsel %vm52_vm1, %v56_v11, %v58_v20  ;;  %v77_v31 = vrot.slane %v29_v2, 2 }
   0xe   :  { %v76_v30 = vsel %vm69_vm2, %v73_v15, %v75_v24  ;;  %v92_v32 = vmul.f32 %v87_v25, %v57_v19  ;;  %v44_v34 = vsel %vm37_vm0, %v41_v16, %v43_v26  ;;  %v45_v38 = vsel %vm37_vm0, %v43_v26, %v31_v3 }
   0xf   :  { %v88_v33 = vsub.f32 %v42_v23, %v76_v30  ;;  %v61_v35 = vsel %vm52_vm1, %v58_v20, %v60_v27  ;;  %v96_v36 = vsub.f32 %v91_v28, %v25_v0  ;;  %v78_v37 = vsel %vm69_vm2, %v75_v24, %v77_v31 }
  0x10   :  { %v68_v39 = vsel %vm52_vm1, %v60_v27, %v53_v5  ;;  %v97_v40 = vsub.f32 %v92_v32, %v26_v1  ;;  %v89_v42 = vsub.f32 %v44_v34, %v78_v37  ;;  %v85_v43 = vsel %vm69_vm2, %v77_v31, %v70_v8 }
  0x11   :  { %v93_v41 = vmul.f32 %v88_v33, %v59_v29  ;;  %v101_v44 = vadd.f32 8.0, %v96_v36  ;;  %v90_v45 = vsub.f32 %v45_v38, %v85_v43 }
  0x12   :  { %v102_v46 = vadd.f32 8.0, %v97_v40  ;;  %v94_v48 = vmul.f32 %v89_v42, %v61_v35 }
  0x13   :  { %v98_v47 = vsub.f32 %v93_v41, %v27_v7  ;;  %107 = vst.msk [vmem:[#allocation5] sm:$0xff] %vm106_vm3, %v101_v44  ;;  %v95_v49 = vmul.f32 %v90_v45, %v68_v39 }
  0x14   :  { %108 = vst.msk [vmem:[#allocation5 + $0x8] sm:$0xff] %vm106_vm3, %v102_v46  ;;  %v99_v51 = vsub.f32 %v94_v48, %v28_v12 }
  0x15   :  { %v103_v50 = vadd.f32 8.0, %v98_v47  ;;  %v100_v52 = vsub.f32 %v95_v49, %v29_v2 }
  0x16   :  { %v104_v53 = vadd.f32 8.0, %v99_v51 }
  0x17   :  { %109 = vst.msk [vmem:[#allocation5 + $0x10] sm:$0xff] %vm106_vm3, %v103_v50  ;;  %v105_v54 = vadd.f32 8.0, %v100_v52 }
  0x18   :  { %110 = vst.msk [vmem:[#allocation5 + $0x18] sm:$0xff] %vm106_vm3, %v104_v53 }
  0x19   :  { %111 = vst.msk [vmem:[#allocation5 + $0x20] sm:$0xff] %vm106_vm3, %v105_v54 }
  0x1a   :  { %124 = dma.vmem_to_hbm [thread:$0]  %s117_s13, 640, %s119_s16, [#allocation4], %s188_s11, %s188_s11, %s189_s12  }
  0x1b   :  { %185 = dma.done.wait [#allocation4], 640  }
  0x1c   :  { %186 = vsyncadd [#allocation4], 4294966656 }
  0x1d   :  { %129 = vsyncpa [#allocation3], 1 }
  0x1e   :  { %130 = vsyncpa [#allocation4], 1 }

</bundles_post_ra>
